<compile_context>
chip_gen: v7x
topology: tpu7x:2x2x1
jax: 0.10.0
libtpu: 0.0.40
codegen_flags: <defaults>
</compile_context>

<pallas_src>
import jax
import jax.numpy as jnp
from jax.experimental import pallas as pl
from jax.experimental.pallas import tpu as pltpu


def _axaddb_kernel(w_ref, b_ref, x_ref, o_ref):
    # w_ref / b_ref: (1,) float32 scalars in SMEM (hoisted once per tile).
    # x_ref / o_ref: (tile_rows, 512) tile in VMEM — lane-dense, 128-aligned.
    w = w_ref[0]
    b = b_ref[0]
    o_ref[...] = (x_ref[...].astype(jnp.float32) * w + b).astype(o_ref.dtype)


def _round_up(a, m):
    return -(-a // m) * m


def _chip_tuning(itemsize, lanes):
    """Per-generation (tile_rows, vmem_limit_bytes, is_v7x) at `lanes` columns."""
    kind = ""
    try:
        kind = jax.devices()[0].device_kind.lower()
    except Exception:
        pass
    if "v5 lite" in kind or "v5lite" in kind or "v5e" in kind:
        # ~0.82 TB/s HBM: 2 MiB tiles already hide the ~0.35 us/step overhead;
        # keep the scoped-VMEM request modest on this generation.
        tile_bytes, vmem_limit, is_v7x = 2 << 20, 24 << 20, False
    elif "v7" in kind or "tpu7" in kind:
        # ~3.2 TB/s HBM, 64 MiB VMEM/TC: bigger tiles amortize per-step cost.
        tile_bytes, vmem_limit, is_v7x = 8 << 20, 48 << 20, True
    else:
        # v6e and unknown generations: 4 MiB tiles, 32 MiB scoped VMEM.
        tile_bytes, vmem_limit, is_v7x = 4 << 20, 32 << 20, False
    tile_rows = max(32, tile_bytes // (lanes * itemsize))
    return tile_rows, vmem_limit, is_v7x


def axaddb(x, weight, bias, *, lanes=512, small_size_bytes=256 * 1024,
           max_tile_rows=None):
    """Elementwise weight*x + bias with scalar weight/bias via a Pallas TPU kernel."""
    orig_shape = x.shape
    dtype = x.dtype
    total = x.size
    itemsize = jnp.dtype(dtype).itemsize

    w32 = jnp.asarray(weight, dtype=jnp.float32).reshape((1,))
    b32 = jnp.asarray(bias, dtype=jnp.float32).reshape((1,))

    # Small-size fast path: below ~small_size_bytes the pallas_call launch /
    # per-step overhead dominates and XLA fuses the scalar a*x+b for free.
    if total * itemsize < small_size_bytes:
        return (x.astype(jnp.float32) * w32[0] + b32[0]).astype(dtype)

    # dtype-aware sublane packing: 8 rows/vreg for 4-byte, 16 for 2-byte, 32 for 1-byte.
    sub = max(8, 32 // itemsize)

    cols = lanes
    rows = -(-total // cols)
    padded_total = rows * cols          # tail pad only (< cols elements)

    flat = x.reshape(-1)
    needs_pad = padded_total != total
    if needs_pad:
        flat = jnp.pad(flat, (0, padded_total - total))
    x2 = flat.reshape(rows, cols)

    default_tile_rows, vmem_limit, is_v7x = _chip_tuning(itemsize, cols)
    if max_tile_rows is not None:
        default_tile_rows = min(default_tile_rows, _round_up(max_tile_rows, sub))

    if rows <= default_tile_rows:
        # Whole slab in a single block: block dims equal full array dims, which
        # the (8,128) rule allows, so no row rounding / padding is needed.
        tile_rows = rows
        # v7x megacore: if the slab is big enough to amortize the ~0.35 us/step
        # overhead, split the row loop so both TensorCores get work.
        if is_v7x and rows >= 2 * sub and rows * cols * itemsize >= (2 << 20):
            tile_rows = _round_up(_round_up(rows, 2) // 2, sub)
    else:
        tile_rows = default_tile_rows

    grid = (-(-rows // tile_rows),)     # Pallas masks the trailing partial block

    out2 = pl.pallas_call(
        _axaddb_kernel,
        out_shape=jax.ShapeDtypeStruct((rows, cols), dtype),
        grid=grid,
        in_specs=[
            pl.BlockSpec(memory_space=pltpu.SMEM),                    # weight (f32)
            pl.BlockSpec(memory_space=pltpu.SMEM),                    # bias (f32)
            pl.BlockSpec((tile_rows, cols), lambda i: (i, 0)),        # x tile
        ],
        out_specs=pl.BlockSpec((tile_rows, cols), lambda i: (i, 0)),  # y tile
        compiler_params=pltpu.CompilerParams(
            dimension_semantics=("parallel",),       # megacore sharding on v7x
            vmem_limit_bytes=vmem_limit,             # generation-aware
        ),
        cost_estimate=pl.CostEstimate(
            flops=2 * padded_total,                  # one mul + one add per element
            transcendentals=0,
            bytes_accessed=2 * padded_total * itemsize,
        ),
    )(w32, b32, x2)

    if needs_pad:
        return out2.reshape(-1)[:total].reshape(orig_shape)
    return out2.reshape(orig_shape)


if __name__ == "__main__":
    key = jax.random.PRNGKey(0)
    kx, kw, kx2 = jax.random.split(key, 3)

    # Small shape consistent with an arbitrary-tensor elementwise module.
    x = jax.random.normal(kx, (2, 4, 16, 16), dtype=jnp.float32)

    # Deterministic parameter init (matches torch.randn(1) / torch.zeros(1)).
    weight = jax.random.normal(kw, (1,), dtype=jnp.float32)
    bias = jnp.zeros((1,), dtype=jnp.float32)

    ref = x * weight[0] + bias[0]

    # small_size_bytes=0 forces the Pallas path even for this small demo tensor.
    out = axaddb(x, weight, bias, small_size_bytes=0)
    jax.block_until_ready(out)
    assert out.shape == x.shape
    assert out.dtype == x.dtype
    assert jnp.allclose(out, ref, atol=1e-6, rtol=1e-6)

    # Second check: non-multiple-of-512 size + forced small tile exercises the
    # tail-pad and trailing partial-block (masked write) paths.
    x_odd = jax.random.normal(kx2, (2, 4, 16, 33), dtype=jnp.float32)
    ref_odd = x_odd * weight[0] + bias[0]
    out_odd = axaddb(x_odd, weight, bias, small_size_bytes=0, max_tile_rows=8)
    jax.block_until_ready(out_odd)
    assert out_odd.shape == x_odd.shape
    assert jnp.allclose(out_odd, ref_odd, atol=1e-6, rtol=1e-6)

    print("KERNEL_OK")
</pallas_src>

<mosaic_0001>
module attributes {stable_mosaic.version = 11 : i64} {
  func.func @_axaddb_kernel(%arg0: i32, %arg1: memref<1xf32, #tpu.memory_space<smem>>, %arg2: memref<1xf32, #tpu.memory_space<smem>>, %arg3: memref<4x512xf32, #tpu.memory_space<vmem>>, %arg4: memref<4x512xf32, #tpu.memory_space<vmem>>) attributes {dimension_semantics = [#tpu.dimension_semantics<parallel>], iteration_bounds = array<i64: 1>, scalar_prefetch = 0 : i64, scratch_operands = 0 : i64, tpu.core_type = #tpu.core_type<tc>, window_params = [{transform_indices = @transform_0, window_bounds = array<i64: 1>}, {transform_indices = @transform_1, window_bounds = array<i64: 1>}, {transform_indices = @transform_2, window_bounds = array<i64: 4, 512>}, {transform_indices = @transform_3, window_bounds = array<i64: 4, 512>}]} {
    %c0 = arith.constant 0 : index
    %0 = memref.load %arg1[%c0] : memref<1xf32, #tpu.memory_space<smem>>
    %c0_0 = arith.constant 0 : index
    %1 = memref.load %arg2[%c0_0] : memref<1xf32, #tpu.memory_space<smem>>
    %c0_1 = arith.constant 0 : index
    %c0_2 = arith.constant 0 : index
    %2 = vector.load %arg3[%c0_1, %c0_2] : memref<4x512xf32, #tpu.memory_space<vmem>>, vector<4x512xf32>
    %3 = vector.broadcast %0 : f32 to vector<4x512xf32>
    %4 = arith.mulf %2, %3 : vector<4x512xf32>
    %5 = vector.broadcast %1 : f32 to vector<4x512xf32>
    %6 = arith.addf %4, %5 : vector<4x512xf32>
    %c0_3 = arith.constant 0 : index
    %c0_4 = arith.constant 0 : index
    %7 = vector.load %arg4[%c0_3, %c0_4] : memref<4x512xf32, #tpu.memory_space<vmem>>, vector<4x512xf32>
    tpu.vector_store %arg4[%c0_3, %c0_4], %6 {strides = array<i32>} : memref<4x512xf32, #tpu.memory_space<vmem>>, vector<4x512xf32>,
    return
  }
  func.func @transform_0(%arg0: i32) -> i32 {
    %c0_i32 = arith.constant 0 : i32
    %c0_i32_0 = arith.constant 0 : i32
    return %c0_i32 : i32
  }
  func.func @transform_1(%arg0: i32) -> i32 {
    %c0_i32 = arith.constant 0 : i32
    %c0_i32_0 = arith.constant 0 : i32
    return %c0_i32 : i32
  }
  func.func @transform_2(%arg0: i32) -> (i32, i32) {
    %c0_i32 = arith.constant 0 : i32
    %c0_i32_0 = arith.constant 0 : i32
    return %arg0, %c0_i32 : i32, i32
  }
  func.func @transform_3(%arg0: i32) -> (i32, i32) {
    %c0_i32 = arith.constant 0 : i32
    %c0_i32_0 = arith.constant 0 : i32
    return %arg0, %c0_i32 : i32, i32
  }
}

</mosaic_0001>

<bundles_post_ra>
// kernel: tpu_custom_call.1
= control target key start
LH: loop header
LB: loop body
LE: loop exit
PB: predicated region body
PF: predicated region fallthrough
CT: control target
= control target key end

     0   :  { %10 = vsyncpa [#allocation5], 0  ;;  %s158_s0 = inlined_call_operand.<no memory space> [shape: f32[1], index: 0, kind: input, shape index: {}]   ;;  %s159_s1 = inlined_call_operand.<no memory space> [shape: f32[1], index: 1, kind: input, shape index: {}]   ;;  %s160_s2 = inlined_call_operand.hbm [shape: f32[4,512], index: 2, kind: input, shape index: {}]   ;;  %s161_s3 = inlined_call_operand.hbm [shape: f32[4,512], index: 3, kind: output, shape index: {}]  }
   0x1   :  { %11 = vsyncpa [#allocation6], 0  ;;  %s106_s12 = smov [#allocation4]   ;;  %s58_s16 = scalar_lea.hbm %s160_s2, 256 }
   0x2   :  { %s22_s13 = sshll.u32 %s106_s12, 4  ;;  %p59_p0 = scmp.ne.s32.totalorder %s160_s2, %s58_s16  ;;  %s23_s13 = int_to_ptr.vmem [resolvable:$true] %s22_s13 }
   0x3   :  { %p62_p1 = scmp.lt.u32.totalorder %s58_s16, %s160_s2 }
   0x5   :  { %p64_p2 = pnand %p62_p1, %p59_p0 }
   0x7   :  { %67 = shalt.err (!%p64_p2)
}
   0x8   :  { %s68_s21 = scalar_lea.vmem %s23_s13, 256  ;;  %p73_p4 = scmp.lt.s32.totalorder %s23_s13, %s23_s13 }
   0x9   :  { %p69_p3 = scmp.ne.s32.totalorder %s23_s13, %s68_s21  ;;  %p74_p5 = scmp.lt.s32.totalorder %s68_s21, %s68_s21 }
   0xb   :  { %p75_p6 = por %p74_p5, %p73_p4 }
   0xd   :  { %p76_p7 = pnand %p75_p6, %p69_p3 }
   0xf   :  { %79 = shalt.err (!%p76_p7)
}
  0x10   :  { %25 = dma.hbm_to_vmem [thread:$0]  %s160_s2, 256, %s23_s13, [#allocation5]  }
  0x11   :  { %102 = dma.done.wait [#allocation5], 256  }
  0x12   :  { %103 = vsyncadd [#allocation5], 4294967040  ;;  %v33_v0 = vstv %s158_s0  ;;  %v31_v1 = vld [vmem:[#allocation4] sm:$0xff]  ;;  %v36_v2 = vstv %s159_s1  ;;  %v32_v3 = vld [vmem:[#allocation4 + $0x8] sm:$0xff]  ;;  %s107_s28 = smov [#allocation7]  }
  0x13   :  { %s47_s29 = sshll.u32 %s107_s28, 4  ;;  %v34_v4 = vmul.f32 %v33_v0, %v31_v1  ;;  %v35_v5 = vmul.f32 %v33_v0, %v32_v3  ;;  %s48_s29 = int_to_ptr.vmem [resolvable:$true] %s47_s29 }
  0x14   :  { %s80_s2 = scalar_lea.vmem %s48_s29, 256  ;;  %p85_p9 = scmp.lt.s32.totalorder %s48_s29, %s48_s29 }
  0x15   :  { %v37_v6 = vadd.f32 %v36_v2, %v34_v4  ;;  %v38_v7 = vadd.f32 %v36_v2, %v35_v5  ;;  %p81_p8 = scmp.ne.s32.totalorder %s48_s29, %s80_s2  ;;  %p86_p10 = scmp.lt.s32.totalorder %s80_s2, %s80_s2 }
  0x17   :  { %39 = vst [vmem:[#allocation7] sm:$0xff] %v37_v6  ;;  %40 = vst [vmem:[#allocation7 + $0x8] sm:$0xff] %v38_v7  ;;  %p87_p11 = por %p86_p10, %p85_p9 }
  0x19   :  { %p88_p12 = pnand %p87_p11, %p81_p8 }
  0x1b   :  { %91 = shalt.err (!%p88_p12)
}
  0x1c   :  { %s92_s1 = scalar_lea.hbm %s161_s3, 256 }
  0x1d   :  { %p93_p13 = scmp.ne.s32.totalorder %s161_s3, %s92_s1  ;;  %p96_p0 = scmp.lt.u32.totalorder %s92_s1, %s161_s3 }
  0x1f   :  { %p98_p1 = pnand %p96_p0, %p93_p13 }
  0x21   :  { %101 = shalt.err (!%p98_p1)
}
  0x22   :  { %50 = dma.vmem_to_hbm [thread:$0]  %s48_s29, 256, %s161_s3, [#allocation6]  }
  0x23   :  { %104 = dma.done.wait [#allocation6], 256  }
  0x24   :  { %105 = vsyncadd [#allocation6], 4294967040 }
  0x25   :  { %54 = vsyncpa [#allocation5], 1 }
  0x26   :  { %55 = vsyncpa [#allocation6], 1 }

</bundles_post_ra>
